<compile_context>
chip_gen: v5e
topology: v5e:2x2
jax: 0.10.0
libtpu: 0.0.40
codegen_flags: <defaults>
</compile_context>

<pallas_src>
import functools

import jax
import jax.numpy as jnp
from jax.experimental import pallas as pl
from jax.experimental.pallas import tpu as pltpu


def _round_up(x, m):
    return ((x + m - 1) // m) * m


def _cte_kernel(x_ref, w_ref, b_ref, g_ref, beta_ref, o_ref, *, eps):
    # x_ref:    (1, K_pad, TM)   patch tile, tokens on lanes
    # w_ref:    (Cout, K_pad)    flattened Conv3d weight (pinned, VMEM-resident)
    # b/g/beta: (Cout, 1)        conv bias / LN gamma / LN beta (pinned)
    # o_ref:    (1, Cout, TM)    channels-first output tile
    x = x_ref[0]                                   # (K_pad, TM)
    w = w_ref[...]                                 # (Cout, K_pad)

    # Conv3d as GEMM on the MXU, f32 accumulation, channels-first result (Cout, TM).
    y = jnp.dot(w, x, preferred_element_type=jnp.float32) + b_ref[...]

    # channels-first LayerNorm: stats over the channel (sublane) axis, per token (lane).
    mean = jnp.mean(y, axis=0, keepdims=True)      # (1, TM)
    diff = y - mean
    var = jnp.mean(diff * diff, axis=0, keepdims=True)
    y_norm = diff * jax.lax.rsqrt(var + eps)

    o_ref[0] = (y_norm * g_ref[...] + beta_ref[...]).astype(o_ref.dtype)


def _im2col_3d_cfirst(x, kernel, stride, padding, k_pad):
    """x: (B, Cin, D, H, W) -> patches (B, k_pad, Do*Ho*Wo), channels-first / tokens-last.

    Column order (Cin-major, then kd, kh, kw) matches PyTorch Conv3d OIDHW weight
    flattening.  K is padded only to `k_pad` (multiple of 16); the token axis is NOT
    padded.  Call with x already cast to the compute dtype so the stack+reshape+pad fuse
    into a single write of the patch tensor in that dtype."""
    B, C, D, H, W = x.shape
    k, s, p = kernel, stride, padding
    Do = (D + 2 * p - k) // s + 1
    Ho = (H + 2 * p - k) // s + 1
    Wo = (W + 2 * p - k) // s + 1
    xp = jnp.pad(x, ((0, 0), (0, 0), (p, p), (p, p), (p, p)))
    pieces = []
    for dz in range(k):
        for dy in range(k):
            for dx in range(k):
                pieces.append(
                    xp[:, :,
                       dz: dz + s * Do: s,
                       dy: dy + s * Ho: s,
                       dx: dx + s * Wo: s])           # (B, C, Do, Ho, Wo)
    pat = jnp.stack(pieces, axis=2)                    # (B, C, k^3, Do, Ho, Wo)
    K = C * k * k * k
    pat = pat.reshape(B, K, Do * Ho * Wo)              # (B, K, Mb)
    if k_pad > K:
        pat = jnp.pad(pat, ((0, 0), (0, k_pad - K), (0, 0)))
    return pat, (Do, Ho, Wo)


def conv_token_embedding(x, conv_w, conv_b, ln_gamma, ln_beta,
                         *, kernel, stride, padding, eps=1e-6,
                         compute_dtype=jnp.float32, out_dtype=jnp.float32,
                         tm_max=None):
    """Forward pass of ConvolutionalTokenEmbedding.

    x:       (B, Cin, D, H, W)   NCDHW
    conv_w:  (Cout, Cin, k, k, k)
    conv_b / ln_gamma / ln_beta: (Cout,)
    returns: (B, Cout, D', H', W')   NCDHW, out_dtype
    """
    B, Cin, D, H, W = x.shape
    Cout = conv_w.shape[0]
    K = Cin * kernel * kernel * kernel
    # Pad the contraction dim only to the sublane tile (16 covers f32 and bf16 packing);
    # never to 128, never on the token axis.
    K_pad = _round_up(K, 16)

    # Cast BEFORE im2col so the inflated patch tensor is written once in compute dtype.
    x = x.astype(compute_dtype)
    patches, (Do, Ho, Wo) = _im2col_3d_cfirst(x, kernel, stride, padding, K_pad)
    Mb = Do * Ho * Wo

    # Token tile: lane-dense, dtype/VMEM aware, >=2 total grid steps for v7x megacore.
    if tm_max is None:
        tm_max = 8192 if compute_dtype == jnp.bfloat16 else 4096
    if Mb <= 128:
        TM = Mb                                    # full-dim block; exempt from 128 rule
    else:
        TM = min(tm_max, _round_up(Mb, 128))
        if B == 1:
            # Keep at least 2 token tiles so both v7x TensorCores get work.
            TM = min(TM, _round_up(pl.cdiv(Mb, 2), 128))
    n_tok_tiles = pl.cdiv(Mb, TM)

    w2d = jnp.pad(conv_w.reshape(Cout, K),
                  ((0, 0), (0, K_pad - K))).astype(compute_dtype)
    b2d = conv_b.reshape(Cout, 1).astype(jnp.float32)
    g2d = ln_gamma.reshape(Cout, 1).astype(jnp.float32)
    be2d = ln_beta.reshape(Cout, 1).astype(jnp.float32)

    grid_spec = pl.GridSpec(
        grid=(B, n_tok_tiles),
        in_specs=[
            pl.BlockSpec((1, K_pad, TM), lambda b, i: (b, 0, i)),   # patch tile
            pl.BlockSpec((Cout, K_pad), lambda b, i: (0, 0)),       # weight (pinned)
            pl.BlockSpec((Cout, 1), lambda b, i: (0, 0)),           # bias   (pinned)
            pl.BlockSpec((Cout, 1), lambda b, i: (0, 0)),           # gamma  (pinned)
            pl.BlockSpec((Cout, 1), lambda b, i: (0, 0)),           # beta   (pinned)
        ],
        out_specs=pl.BlockSpec((1, Cout, TM), lambda b, i: (b, 0, i)),
    )

    in_itemsize = jnp.dtype(compute_dtype).itemsize
    out_itemsize = jnp.dtype(out_dtype).itemsize
    cost = pl.CostEstimate(
        flops=2 * B * Cout * K_pad * Mb + 10 * B * Cout * Mb,
        transcendentals=B * Mb,
        bytes_accessed=(B * K_pad * Mb * in_itemsize       # patch read (dominant)
                        + Cout * K_pad * in_itemsize       # weight read
                        + B * Cout * Mb * out_itemsize),   # output write
    )

    out = pl.pallas_call(
        functools.partial(_cte_kernel, eps=eps),
        out_shape=jax.ShapeDtypeStruct((B, Cout, Mb), out_dtype),
        grid_spec=grid_spec,
        compiler_params=pltpu.CompilerParams(
            dimension_semantics=("parallel", "parallel"),
            vmem_limit_bytes=32 * 1024 * 1024),
        cost_estimate=cost,
    )(patches, w2d, b2d, g2d, be2d)

    # Output is already exact-shaped and channels-first; reshape is metadata-only.
    return out.reshape(B, Cout, Do, Ho, Wo)


def _reference(x, conv_w, conv_b, ln_gamma, ln_beta, *, kernel, stride, padding, eps=1e-6):
    """Plain-JAX reference matching the PyTorch forward."""
    y = jax.lax.conv_general_dilated(
        x, conv_w,
        window_strides=(stride,) * 3,
        padding=[(padding, padding)] * 3,
        dimension_numbers=("NCDHW", "OIDHW", "NCDHW"),
    ) + conv_b[None, :, None, None, None]
    u = y.mean(axis=1, keepdims=True)
    s = ((y - u) ** 2).mean(axis=1, keepdims=True)
    yn = (y - u) / jnp.sqrt(s + eps)
    return ln_gamma[None, :, None, None, None] * yn + ln_beta[None, :, None, None, None]


if __name__ == "__main__":
    # Small, Conv3d-consistent shapes: B=2, Cin=4, D=H=W=8, Cout=32, k=3, s=2, p=1.
    B, Cin, D, H, W = 2, 4, 8, 8, 8
    Cout, kernel, stride, padding = 32, 3, 2, 1

    key = jax.random.PRNGKey(0)
    kx, kw, kb = jax.random.split(key, 3)

    x = jax.random.normal(kx, (B, Cin, D, H, W), dtype=jnp.float32)
    conv_w = 0.1 * jax.random.normal(
        kw, (Cout, Cin, kernel, kernel, kernel), dtype=jnp.float32)
    conv_b = 0.1 * jax.random.normal(kb, (Cout,), dtype=jnp.float32)
    ln_gamma = jnp.ones((Cout,), dtype=jnp.float32)   # LayerNorm init: ones
    ln_beta = jnp.zeros((Cout,), dtype=jnp.float32)   # LayerNorm init: zeros

    ref = _reference(
        x, conv_w, conv_b, ln_gamma, ln_beta,
        kernel=kernel, stride=stride, padding=padding)
    ref = jax.block_until_ready(ref)

    # f32 path: matches the PyTorch-equivalent reference tightly.
    out = conv_token_embedding(
        x, conv_w, conv_b, ln_gamma, ln_beta,
        kernel=kernel, stride=stride, padding=padding,
        compute_dtype=jnp.float32, out_dtype=jnp.float32)
    out = jax.block_until_ready(out)

    assert out.shape == ref.shape == (B, Cout, 4, 4, 4), (out.shape, ref.shape)
    assert jnp.max(jnp.abs(out - ref)) < 1e-4, float(jnp.max(jnp.abs(out - ref)))

    # bf16 operand + bf16 output path (f32 MXU accumulation + f32 LayerNorm):
    # halves both the dominant HBM read stream and the store stream.
    out_bf16 = conv_token_embedding(
        x, conv_w, conv_b, ln_gamma, ln_beta,
        kernel=kernel, stride=stride, padding=padding,
        compute_dtype=jnp.bfloat16, out_dtype=jnp.bfloat16)
    out_bf16 = jax.block_until_ready(out_bf16)

    assert out_bf16.shape == ref.shape
    err = float(jnp.max(jnp.abs(out_bf16.astype(jnp.float32) - ref)))
    assert err < 1e-1, err

    print("KERNEL_OK")
</pallas_src>

<mosaic_0001>
module attributes {stable_mosaic.version = 11 : i64} {
  func.func @_cte_kernel(%arg0: i32, %arg1: i32, %arg2: memref<1x112x64xf32, #tpu.memory_space<vmem>>, %arg3: memref<32x112xf32, #tpu.memory_space<vmem>>, %arg4: memref<32x1xf32, #tpu.memory_space<vmem>>, %arg5: memref<32x1xf32, #tpu.memory_space<vmem>>, %arg6: memref<32x1xf32, #tpu.memory_space<vmem>>, %arg7: memref<1x32x64xf32, #tpu.memory_space<vmem>>) attributes {dimension_semantics = [#tpu.dimension_semantics<parallel>, #tpu.dimension_semantics<parallel>], iteration_bounds = array<i64: 2, 1>, scalar_prefetch = 0 : i64, scratch_operands = 0 : i64, tpu.core_type = #tpu.core_type<tc>, window_params = [{transform_indices = @transform_0, window_bounds = array<i64: 1, 112, 64>}, {pipeline_mode = #tpu.pipeline_mode<synchronous>, transform_indices = @transform_1, window_bounds = array<i64: 32, 112>}, {pipeline_mode = #tpu.pipeline_mode<synchronous>, transform_indices = @transform_2, window_bounds = array<i64: 32, 1>}, {pipeline_mode = #tpu.pipeline_mode<synchronous>, transform_indices = @transform_3, window_bounds = array<i64: 32, 1>}, {pipeline_mode = #tpu.pipeline_mode<synchronous>, transform_indices = @transform_4, window_bounds = array<i64: 32, 1>}, {transform_indices = @transform_5, window_bounds = array<i64: 1, 32, 64>}]} {
    %c0 = arith.constant 0 : index
    %c0_0 = arith.constant 0 : index
    %c0_1 = arith.constant 0 : index
    %0 = vector.load %arg2[%c0, %c0_0, %c0_1] : memref<1x112x64xf32, #tpu.memory_space<vmem>>, vector<1x112x64xf32>
    %1 = vector.shape_cast %0 : vector<1x112x64xf32> to vector<112x64xf32>
    %c0_2 = arith.constant 0 : index
    %c0_3 = arith.constant 0 : index
    %2 = vector.load %arg3[%c0_2, %c0_3] : memref<32x112xf32, #tpu.memory_space<vmem>>, vector<32x112xf32>
    %cst = arith.constant dense<0.000000e+00> : vector<32x64xf32>
    %3 = tpu.matmul %2, %1, %cst {dimension_numbers = #tpu.dot_dimension_numbers<[1], [0], [0], [1], [0, 0, 1, 1], [], []>} : vector<32x112xf32>, vector<112x64xf32>, vector<32x64xf32> -> vector<32x64xf32>
    %c0_4 = arith.constant 0 : index
    %c0_5 = arith.constant 0 : index
    %4 = vector.load %arg4[%c0_4, %c0_5] : memref<32x1xf32, #tpu.memory_space<vmem>>, vector<32x1xf32>
    %5 = vector.broadcast %4 : vector<32x1xf32> to vector<32x64xf32>
    %6 = arith.addf %3, %5 : vector<32x64xf32>
    %cst_6 = arith.constant dense<0.000000e+00> : vector<64xf32>
    %7 = vector.multi_reduction <add>, %6, %cst_6 [0] : vector<32x64xf32> to vector<64xf32>
    %8 = vector.shape_cast %7 : vector<64xf32> to vector<1x64xf32>
    %cst_7 = arith.constant 3.200000e+01 : f32
    %9 = vector.broadcast %cst_7 : f32 to vector<1x64xf32>
    %10 = arith.divf %8, %9 : vector<1x64xf32>
    %11 = vector.broadcast %10 : vector<1x64xf32> to vector<32x64xf32>
    %12 = arith.subf %6, %11 : vector<32x64xf32>
    %13 = arith.mulf %12, %12 : vector<32x64xf32>
    %cst_8 = arith.constant dense<0.000000e+00> : vector<64xf32>
    %14 = vector.multi_reduction <add>, %13, %cst_8 [0] : vector<32x64xf32> to vector<64xf32>
    %15 = vector.shape_cast %14 : vector<64xf32> to vector<1x64xf32>
    %cst_9 = arith.constant 3.200000e+01 : f32
    %16 = vector.broadcast %cst_9 : f32 to vector<1x64xf32>
    %17 = arith.divf %15, %16 : vector<1x64xf32>
    %cst_10 = arith.constant 9.99999997E-7 : f32
    %18 = vector.broadcast %cst_10 : f32 to vector<1x64xf32>
    %19 = arith.addf %17, %18 : vector<1x64xf32>
    %20 = math.rsqrt %19 : vector<1x64xf32>
    %21 = vector.broadcast %20 : vector<1x64xf32> to vector<32x64xf32>
    %22 = arith.mulf %12, %21 : vector<32x64xf32>
    %c0_11 = arith.constant 0 : index
    %c0_12 = arith.constant 0 : index
    %23 = vector.load %arg5[%c0_11, %c0_12] : memref<32x1xf32, #tpu.memory_space<vmem>>, vector<32x1xf32>
    %24 = vector.broadcast %23 : vector<32x1xf32> to vector<32x64xf32>
    %25 = arith.mulf %22, %24 : vector<32x64xf32>
    %c0_13 = arith.constant 0 : index
    %c0_14 = arith.constant 0 : index
    %26 = vector.load %arg6[%c0_13, %c0_14] : memref<32x1xf32, #tpu.memory_space<vmem>>, vector<32x1xf32>
    %27 = vector.broadcast %26 : vector<32x1xf32> to vector<32x64xf32>
    %28 = arith.addf %25, %27 : vector<32x64xf32>
    %c0_15 = arith.constant 0 : index
    %c0_16 = arith.constant 0 : index
    %c0_17 = arith.constant 0 : index
    %29 = vector.load %arg7[%c0_15, %c0_16, %c0_17] : memref<1x32x64xf32, #tpu.memory_space<vmem>>, vector<1x32x64xf32>
    %30 = vector.shape_cast %29 : vector<1x32x64xf32> to vector<32x64xf32>
    %31 = vector.shape_cast %28 : vector<32x64xf32> to vector<1x32x64xf32>
    tpu.vector_store %arg7[%c0_15, %c0_16, %c0_17], %31 {strides = array<i32>} : memref<1x32x64xf32, #tpu.memory_space<vmem>>, vector<1x32x64xf32>,
    return
  }
  func.func @transform_0(%arg0: i32, %arg1: i32) -> (i32, i32, i32) {
    %c0_i32 = arith.constant 0 : i32
    %c0_i32_0 = arith.constant 0 : i32
    return %arg0, %c0_i32, %arg1 : i32, i32, i32
  }
  func.func @transform_1(%arg0: i32, %arg1: i32) -> (i32, i32) {
    %c0_i32 = arith.constant 0 : i32
    %c0_i32_0 = arith.constant 0 : i32
    %c0_i32_1 = arith.constant 0 : i32
    return %c0_i32, %c0_i32_0 : i32, i32
  }
  func.func @transform_2(%arg0: i32, %arg1: i32) -> (i32, i32) {
    %c0_i32 = arith.constant 0 : i32
    %c0_i32_0 = arith.constant 0 : i32
    %c0_i32_1 = arith.constant 0 : i32
    return %c0_i32, %c0_i32_0 : i32, i32
  }
  func.func @transform_3(%arg0: i32, %arg1: i32) -> (i32, i32) {
    %c0_i32 = arith.constant 0 : i32
    %c0_i32_0 = arith.constant 0 : i32
    %c0_i32_1 = arith.constant 0 : i32
    return %c0_i32, %c0_i32_0 : i32, i32
  }
  func.func @transform_4(%arg0: i32, %arg1: i32) -> (i32, i32) {
    %c0_i32 = arith.constant 0 : i32
    %c0_i32_0 = arith.constant 0 : i32
    %c0_i32_1 = arith.constant 0 : i32
    return %c0_i32, %c0_i32_0 : i32, i32
  }
  func.func @transform_5(%arg0: i32, %arg1: i32) -> (i32, i32, i32) {
    %c0_i32 = arith.constant 0 : i32
    %c0_i32_0 = arith.constant 0 : i32
    return %arg0, %c0_i32, %arg1 : i32, i32, i32
  }
}

</mosaic_0001>

<bundles_post_ra>
// kernel: tpu_custom_call.1
= control target key start
LH: loop header
LB: loop body
LE: loop exit
PB: predicated region body
PF: predicated region fallthrough
CT: control target
= control target key end

     0   :  { %10 = vsyncpa [#allocation3], 0  ;;  %s963_s0 = inlined_call_operand.vmem [shape: f32[2,112,64], index: 0, kind: input, shape index: {}]   ;;  %s964_s1 = inlined_call_operand.vmem [shape: f32[32,112], index: 1, kind: input, shape index: {}]   ;;  %s965_s2 = inlined_call_operand.vmem [shape: f32[32,1], index: 2, kind: input, shape index: {}]   ;;  %s966_s3 = inlined_call_operand.vmem [shape: f32[32,1], index: 3, kind: input, shape index: {}]   ;;  %s967_s4 = inlined_call_operand.vmem [shape: f32[32,1], index: 4, kind: input, shape index: {}]   ;;  %s968_s5 = inlined_call_operand.hbm [shape: f32[2,32,64], index: 5, kind: output, shape index: {}]  }
   0x1   :  { %12 = vsyncpa [#allocation3 + $0x1], 0  ;;  %s786_s18 = smov 0   ;;  %s788_s19 = smov 0  }
   0x2   :  { %s790_s20 = smov 0   ;;  %s792_s21 = smov 0  }
   0x3   :  { %s794_s22 = smov 0   ;;  %s796_s23 = smov 0  }
   0x4 LB: > { %s546_s24 = sadd.s32 4294967295, %s750_s23   ;;  %s547_s25 = sadd.s32 4294967294, %s750_s23   ;;  %s750_s23 = sphi %s796_s23, %s18_s23   ;;  %s746_s22 = sphi %s794_s22, %s975_s22   ;;  %s742_s21 = sphi %s792_s21, %s974_s21   ;;  %s738_s20 = sphi %s790_s20, %s973_s20   ;;  %s734_s19 = sphi %s788_s19, %s972_s19   ;;  %s730_s18 = sphi %s786_s18, %s971_s18  }
   0x5   : > { %s30_s26 = sadd.s32 1, %s746_s22  ;;  %s151_s27 = sadd.s32 1, %s738_s20 }
   0x6   : > { %p32_p0 = scmp.ge.s32.totalorder %s30_s26, 2  ;;  %p161_p1 = scmp.ne.s32.totalorder %s738_s20, %s734_s19 }
   0x7   : > { %p162_p2 = scmp.eq.s32.totalorder %s546_s24, 1  ;;  %p167_p3 = scmp.ne.s32.totalorder %s734_s19, %s730_s18 }
   0x8   : > { %s977_s26 = smov (%p32_p0, %s30_s26), 0  ;;  %p168_p5 = scmp.eq.s32.totalorder %s547_s25, 1 }
   0x9   : > { %p826_p4 = por %p162_p2, %p161_p1  ;;  %s146_s29 = ssub.s32 %s746_s22, %s977_s26 }
   0xa   : > { %p550_p6 = scmp.ge.s32.totalorder %s750_s23, 1  ;;  %p149_p7 = scmp.eq.s32.totalorder %s146_s29, 0 }
   0xb   : > { %p833_p8 = por %p168_p5, %p167_p3  ;;  %p209_p9 = scmp.lt.s32.totalorder %s750_s23, 3 }
   0xc   : > { %s839_s6 = scalar_select %p149_p7, %s738_s20, %s151_s27  }
   0xd   : > { %p210_p10 = pnand %p550_p6, %p209_p9 }
   0xe   : > { %p240_p11 = scmp.lt.s32.totalorder (!%p210_p10), %s742_s21, 1  ;;  %s237_s14 = sand.u32 (!%p210_p10), 1, %s734_s19  }
   0xf   : > { %213 = sbr.rel (%p210_p10) target bundleno = 267 (0x10b), region = 40  ;;  %s562_s16 = sshll.u32 (!%p210_p10), %s742_s21, 5 }
  0x10   : > { %s464_s25 = scalar_lea.hbm (!%p210_p10), %s968_s5, %s562_s16  ;;  %s452_s7 = scalar_lea.sflag (!%p210_p10), [#allocation3], %s237_s14 }
  0x14   : > { %v266_v0 = vld [vmem:[%s965_s2] sm:$0xff]  ;;  %v268_v1 = vld [vmem:[%s965_s2 + $0x10] sm:$0xff]  ;;  %v752_v2 = vmov 0   ;;  %s241_s11 = scalar_select %p240_p11, %s742_s21, 1  ;;  %v267_v12 = vld [vmem:[%s965_s2 + $0x8] sm:$0xff]  ;;  %vm290_vm0 = vcmask 916480  }
  0x15   : > { %665 = vset.pattern.permute.xlu0 %v752_v2  ;;  %666 = vset.pattern.permute.xlu1 %v752_v2  ;;  %v269_v15 = vld [vmem:[%s965_s2 + $0x18] sm:$0xff]  ;;  %v393_v18 = vld [vmem:[%s966_s3 + $0x10] sm:$0xff]  ;;  %v262_v20 = vld [vmem:[%s964_s1] sm:$0xff]  ;;  %v753_v33 = vmov 32.0   ;;  %vm332_vm1 = vcmask 523264   ;;  %s467_s21 = sshll.u32 %s464_s25, 4  ;;  %s468_s21 = int_to_ptr.hbm [resolvable:$true] %s467_s21 }
  0x16   : > { %272 = vperm.xlu0 %665, %v266_v0   ;;  %282 = vperm.xlu1 %666, %v268_v1   ;;  %s605_s12 = smul.u32 112, %s241_s11  ;;  %v263_v21 = vld [vmem:[%s964_s1 + $0x8] sm:$0xff]  ;;  %v264_v22 = vld [vmem:[%s964_s1 + $0x10] sm:$0xff]  ;;  %v265_v23 = vld [vmem:[%s964_s1 + $0x18] sm:$0xff]  ;;  %668 = vrcp.f32 %v753_v33  ;;  %s686_s8 = sshra.s32 %s468_s21, 4  ;;  %s687_s8 = int_to_ptr.hbm [resolvable:$true] %s686_s8 }
  0x17   : > { %667 = vset.pattern.permute.xlu2 %v752_v2  ;;  %v394_v24 = vld [vmem:[%s966_s3 + $0x18] sm:$0xff]  ;;  %v391_v25 = vld [vmem:[%s966_s3] sm:$0xff]  ;;  %v420_v26 = vld [vmem:[%s967_s4 + $0x8] sm:$0xff]  ;;  %s688_s9 = scalar_lea.hbm %s687_s8, 32  ;;  %p693_p1 = scmp.lt.s32.totalorder %s687_s8, %s968_s5 }
  0x18   : > { %s852_s15 = scalar_lea.vmem %s963_s0, %s605_s12  ;;  %397 = vperm.xlu2 %667, %v391_v25   ;;  %v421_v27 = vld [vmem:[%s967_s4 + $0x10] sm:$0xff]  ;;  %v392_v28 = vld [vmem:[%s966_s3 + $0x8] sm:$0xff]  ;;  %v419_v29 = vld [vmem:[%s967_s4] sm:$0xff]  ;;  %p689_p12 = scmp.ne.s32.totalorder %s687_s8, %s688_s9 }
  0x19   : > { %v261_v3 = vld [vmem:[%s852_s15 + $0x68] sm:$0xff]  ;;  %v260_v4 = vld [vmem:[%s852_s15 + $0x60] sm:$0xff]  ;;  %v259_v5 = vld [vmem:[%s852_s15 + $0x58] sm:$0xff]  ;;  %s692_s12 = scalar_lea.hbm %s968_s5, 64 }
  0x1a   : > { %305 = vmatpush.msra.mxu0 %v261_v3  ;;  %563 = vmatpush.msra.mxu1 %v261_v3  ;;  %v258_v6 = vld [vmem:[%s852_s15 + $0x50] sm:$0xff]  ;;  %v257_v7 = vld [vmem:[%s852_s15 + $0x48] sm:$0xff]  ;;  %v256_v8 = vld [vmem:[%s852_s15 + $0x40] sm:$0xff]  ;;  %p690_p13 = pnand %p689_p12, %p826_p4  ;;  %p694_p2 = scmp.lt.s32.totalorder %s692_s12, %s688_s9 }
  0x1b   : > { %564 = vmatpush.msra.mxu2 %v261_v3  ;;  %565 = vmatpush.msra.mxu3 %v261_v3  ;;  %v255_v9 = vld [vmem:[%s852_s15 + $0x38] sm:$0xff]  ;;  %v254_v10 = vld [vmem:[%s852_s15 + $0x30] sm:$0xff]  ;;  %v253_v11 = vld [vmem:[%s852_s15 + $0x28] sm:$0xff] }
  0x1c   : > { %306 = vmatpush.msra.mxu0 %v260_v4  ;;  %566 = vmatpush.msra.mxu1 %v260_v4  ;;  %v252_v13 = vld [vmem:[%s852_s15 + $0x20] sm:$0xff]  ;;  %v251_v14 = vld [vmem:[%s852_s15 + $0x18] sm:$0xff]  ;;  %v250_v16 = vld [vmem:[%s852_s15 + $0x10] sm:$0xff]  ;;  %v669_v39 = vpop.eup %668  ;;  %p691_p0 = pneg %p690_p13  ;;  %p695_p3 = por %p694_p2, %p693_p1 }
  0x1d   : > { %567 = vmatpush.msra.mxu2 %v260_v4  ;;  %568 = vmatpush.msra.mxu3 %v260_v4  ;;  %v249_v17 = vld [vmem:[%s852_s15 + $0x8] sm:$0xff]  ;;  %v248_v19 = vld [vmem:[%s852_s15] sm:$0xff]  ;;  %v422_v30 = vld [vmem:[%s967_s4 + $0x18] sm:$0xff]  ;;  %v347_v46 = vmul.f32 32.0, %v669_v39  ;;  %vm351_vm2 = vweird.f32 %v669_v39  ;;  %s551_s15 = sshll.u32 %s237_s14, 5 }
  0x1e   : > { %307 = vmatpush.msra.mxu0 %v259_v5  ;;  %569 = vmatpush.msra.mxu1 %v259_v5  ;;  %s239_s27 = scalar_lea.vmem [#allocation2], %s551_s15  ;;  %p696_p5 = pnand %p695_p3, %p691_p0 }
  0x1f   : > { %570 = vmatpush.msra.mxu2 %v259_v5  ;;  %571 = vmatpush.msra.mxu3 %v259_v5  ;;  %v348_v52 = vsub.f32 1.0, %v347_v46  ;;  %s465_s29 = sshll.u32 %s239_s27, 4  ;;  %s466_s29 = int_to_ptr.vmem [resolvable:$true] %s465_s29 }
  0x20   : > { %308 = vmatpush.msra.mxu0 %v258_v6  ;;  %572 = vmatpush.msra.mxu1 %v258_v6 }
  0x21   : > { %573 = vmatpush.msra.mxu2 %v258_v6  ;;  %574 = vmatpush.msra.mxu3 %v258_v6  ;;  %v349_v55 = vmul.f32 %v669_v39, %v348_v52 }
  0x22   : > { %309 = vmatpush.msra.mxu0 %v257_v7  ;;  %575 = vmatpush.msra.mxu1 %v257_v7 }
  0x23   : > { %576 = vmatpush.msra.mxu2 %v257_v7  ;;  %577 = vmatpush.msra.mxu3 %v257_v7  ;;  %v350_v58 = vadd.f32 %v669_v39, %v349_v55 }
  0x24   : > { %310 = vmatpush.msra.mxu0 %v256_v8  ;;  %578 = vmatpush.msra.mxu1 %v256_v8 }
  0x25   : > { %579 = vmatpush.msra.mxu2 %v256_v8  ;;  %580 = vmatpush.msra.mxu3 %v256_v8  ;;  %v352_v61 = vsel %vm351_vm2, %v669_v39, %v350_v58 }
  0x26   : > { %311 = vmatpush.msra.mxu0 %v255_v9  ;;  %581 = vmatpush.msra.mxu1 %v255_v9 }
  0x27   : > { %582 = vmatpush.msra.mxu2 %v255_v9  ;;  %583 = vmatpush.msra.mxu3 %v255_v9 }
  0x28   : > { %312 = vmatpush.msra.mxu0 %v254_v10  ;;  %584 = vmatpush.msra.mxu1 %v254_v10 }
  0x29   : > { %585 = vmatpush.msra.mxu2 %v254_v10  ;;  %586 = vmatpush.msra.mxu3 %v254_v10 }
  0x2a   : > { %313 = vmatpush.msra.mxu0 %v253_v11  ;;  %587 = vmatpush.msra.mxu1 %v253_v11 }
  0x2b   : > { %588 = vmatpush.msra.mxu2 %v253_v11  ;;  %589 = vmatpush.msra.mxu3 %v253_v11 }
  0x2c   : > { %277 = vperm.xlu0 %665, %v267_v12   ;;  %314 = vmatpush.msra.mxu0 %v252_v13 }
  0x2d   : > { %590 = vmatpush.msra.mxu1 %v252_v13  ;;  %591 = vmatpush.msra.mxu2 %v252_v13 }
  0x2e   : > { %592 = vmatpush.msra.mxu3 %v252_v13  ;;  %315 = vmatpush.msra.mxu0 %v251_v14 }
  0x2f   : > { %593 = vmatpush.msra.mxu1 %v251_v14  ;;  %594 = vmatpush.msra.mxu2 %v251_v14 }
  0x30   : > { %595 = vmatpush.msra.mxu3 %v251_v14  ;;  %287 = vperm.xlu1 %666, %v269_v15  }
  0x31   : > { %316 = vmatpush.msra.mxu0 %v250_v16  ;;  %596 = vmatpush.msra.mxu1 %v250_v16 }
  0x32   : > { %597 = vmatpush.msra.mxu2 %v250_v16  ;;  %598 = vmatpush.msra.mxu3 %v250_v16 }
  0x33   : > { %317 = vmatpush.msra.mxu0 %v249_v17  ;;  %599 = vmatpush.msra.mxu1 %v249_v17 }
  0x34   : > { %600 = vmatpush.msra.mxu2 %v249_v17  ;;  %601 = vmatpush.msra.mxu3 %v249_v17 }
  0x35   : > { %407 = vperm.xlu0 %665, %v393_v18   ;;  %318 = vmatpush.msra.mxu0 %v248_v19 }
  0x36   : > { %602 = vmatpush.msra.mxu1 %v248_v19  ;;  %603 = vmatpush.msra.mxu2 %v248_v19 }
  0x37   : > { %604 = vmatpush.msra.mxu3 %v248_v19  ;;  %553 = vmatmul.msk.f32.vlgmr.msra.gmra.mxu0 %vm290_vm0, %v262_v20 }
  0x38   : > { %554 = vmatmul.msk.f32.vlgmr.msra.gmra.mxu1 %vm290_vm0, %v263_v21  ;;  %555 = vmatmul.msk.f32.vlgmr.msra.gmra.mxu2 %vm290_vm0, %v264_v22 }
  0x39   : > { %556 = vmatmul.msk.f32.vlgmr.msra.gmra.mxu3 %vm290_vm0, %v265_v23  ;;  %412 = vperm.xlu1 %666, %v394_v24  }
  0x3a   : > { %402 = vperm.xlu2 %667, %v392_v28  }
  0x3d   : > { %430 = vperm.xlu0 %665, %v420_v26  }
  0x41   : > { %435 = vperm.xlu1 %666, %v421_v27  }
  0x42   : > { %425 = vperm.xlu2 %667, %v419_v29  }
  0x4a   : > { %440 = vperm.xlu2 %667, %v422_v30  }
  0x72   : > { %v398_v19 = vpop.permute.xlu2 %397 }
  0x88   : > { %v273_v31 = vpop.permute.xlu0 %272  ;;  %v283_v32 = vpop.permute.xlu1 %282 }
  0x94   : > { %v403_v24 = vpop.permute.xlu2 %402 }
  0x9e   : > { %v278_v35 = vpop.permute.xlu0 %277 }
  0xa2   : > { %v288_v43 = vpop.permute.xlu1 %287 }
  0xa7   : > { %v408_v28 = vpop.permute.xlu0 %407 }
  0xab   : > { %v413_v29 = vpop.permute.xlu1 %412 }
  0xb4   : > { %v320_v34 = vpop.f32.mrf.mxu0 }
  0xb5   : > { %v323_v36 = vpop.f32.mrf.mxu1  ;;  %v321_v37 = vadd.f32 %v320_v34, %v273_v31  ;;  %v426_v31 = vpop.permute.xlu2 %425 }
  0xb6   : > { %v324_v38 = vadd.f32 %v323_v36, %v278_v35 }
  0xb7   : > { %v333_v40 = vsel %vm332_vm1, %v321_v37, 0.0 }
  0xb8   : > { %v334_v41 = vsel %vm332_vm1, %v324_v38, 0.0 }
  0xb9   : > { %v335_v47 = vadd.f32 %v334_v41, %v333_v40 }
  0xbb   : > { %v326_v42 = vpop.f32.mrf.mxu2 }
  0xbc   : > { %v327_v44 = vadd.f32 %v326_v42, %v283_v32  ;;  %v329_v45 = vpop.f32.mrf.mxu3 }
  0xbd   : > { %v330_v48 = vadd.f32 %v329_v45, %v288_v43  ;;  %v431_v43 = vpop.permute.xlu0 %430 }
  0xbe   : > { %v336_v49 = vsel %vm332_vm1, %v327_v44, 0.0 }
  0xbf   : > { %v337_v50 = vadd.f32 %v336_v49, %v335_v47  ;;  %v338_v51 = vsel %vm332_vm1, %v330_v48, 0.0 }
  0xc1   : > { %v339_v53 = vadd.f32 %v338_v51, %v337_v50 }
  0xc3   : > { %v340_v54 = vrot.slane %v339_v53, 4 }
  0xc5   : > { %v341_v56 = vadd.f32 %v340_v54, %v339_v53 }
  0xc7   : > { %v342_v57 = vrot.slane %v341_v56, 2 }
  0xc9   : > { %v343_v59 = vadd.f32 %v342_v57, %v341_v56 }
  0xcb   : > { %v344_v60 = vrot.slane %v343_v59, 1 }
  0xcd   : > { %v345_v62 = vadd.f32 %v344_v60, %v343_v59 }
  0xcf   : > { %v353_v63 = vmul.f32 %v352_v61, %v345_v62 }
  0xd1   : > { %v355_v0 = vsub.f32 %v324_v38, %v353_v63  ;;  %v357_v1 = vsub.f32 %v330_v48, %v353_v63  ;;  %v354_v2 = vsub.f32 %v321_v37, %v353_v63  ;;  %v356_v3 = vsub.f32 %v327_v44, %v353_v63  ;;  %v436_v44 = vpop.permute.xlu1 %435  ;;  %v441_v48 = vpop.permute.xlu2 %440 }
  0xd3   : > { %v358_v4 = vmul.f32 %v354_v2, %v354_v2  ;;  %v359_v5 = vmul.f32 %v355_v0, %v355_v0  ;;  %v360_v6 = vmul.f32 %v356_v3, %v356_v3  ;;  %v361_v7 = vmul.f32 %v357_v1, %v357_v1 }
  0xd5   : > { %v362_v8 = vsel %vm332_vm1, %v358_v4, 0.0  ;;  %v363_v9 = vsel %vm332_vm1, %v359_v5, 0.0  ;;  %v365_v11 = vsel %vm332_vm1, %v360_v6, 0.0  ;;  %v367_v13 = vsel %vm332_vm1, %v361_v7, 0.0 }
  0xd6   : > { %v364_v10 = vadd.f32 %v363_v9, %v362_v8 }
  0xd8   : > { %v366_v12 = vadd.f32 %v365_v11, %v364_v10 }
  0xda   : > { %v368_v14 = vadd.f32 %v367_v13, %v366_v12 }
  0xdc   : > { %v369_v15 = vrot.slane %v368_v14, 4 }
  0xde   : > { %v370_v16 = vadd.f32 %v369_v15, %v368_v14 }
  0xe0   : > { %v371_v17 = vrot.slane %v370_v16, 2 }
  0xe2   : > { %v372_v18 = vadd.f32 %v371_v17, %v370_v16 }
  0xe4   : > { %v373_v20 = vrot.slane %v372_v18, 1 }
  0xe6   : > { %v374_v21 = vadd.f32 %v373_v20, %v372_v18 }
  0xe8   : > { %v375_v22 = vmul.f32 %v374_v21, %v352_v61 }
  0xea   : > { %v376_v23 = vadd.f32 1e-06, %v375_v22 }
  0xec   : > { %670 = vrsqrt.f32 %v376_v23  ;;  %vm383_vm4 = vweird.f32 %v376_v23 }
  0xf2   : > { %v671_v25 = vpop.eup %670 }
  0xf3   : > { %v378_v26 = vmul.f32 %v671_v25, %v376_v23  ;;  %vm384_vm3 = vweird.f32 %v671_v25 }
  0xf4   : > { %vm385_vm5 = vmor %vm383_vm4, %vm384_vm3 }
  0xf5   : > { %v379_v27 = vmul.f32 %v671_v25, %v378_v26 }
  0xf7   : > { %v380_v30 = vmul.f32 0.5, %v379_v27 }
  0xf9   : > { %v381_v32 = vsub.f32 1.5, %v380_v30 }
  0xfb   : > { %v382_v33 = vmul.f32 %v671_v25, %v381_v32 }
  0xfd   : > { %v386_v34 = vsel %vm385_vm5, %v671_v25, %v382_v33 }
  0xfe   : > { %v387_v35 = vmul.f32 %v386_v34, %v354_v2  ;;  %v389_v36 = vmul.f32 %v386_v34, %v356_v3  ;;  %v388_v37 = vmul.f32 %v386_v34, %v355_v0  ;;  %v390_v38 = vmul.f32 %v386_v34, %v357_v1 }
 0x100   : > { %v415_v39 = vmul.f32 %v398_v19, %v387_v35  ;;  %v417_v40 = vmul.f32 %v408_v28, %v389_v36  ;;  %v416_v41 = vmul.f32 %v403_v24, %v388_v37  ;;  %v418_v42 = vmul.f32 %v413_v29, %v390_v38 }
 0x102   : > { %v445_v45 = vadd.f32 %v436_v44, %v417_v40  ;;  %v444_v46 = vadd.f32 %v431_v43, %v416_v41  ;;  %v443_v47 = vadd.f32 %v426_v31, %v415_v39  ;;  %v446_v49 = vadd.f32 %v441_v48, %v418_v42 }
 0x104   : > { %448 = vst.msk [vmem:[%s239_s27 + $0x8] sm:$0xff] %vm332_vm1, %v444_v46 }
 0x105   : > { %449 = vst.msk [vmem:[%s239_s27 + $0x10] sm:$0xff] %vm332_vm1, %v445_v45 }
 0x106   : > { %447 = vst.msk [vmem:[%s239_s27] sm:$0xff] %vm332_vm1, %v443_v47 }
 0x107   : > { %450 = vst.msk [vmem:[%s239_s27 + $0x18] sm:$0xff] %vm332_vm1, %v446_v49 }
 0x108   : > { %699 = shalt.err (!%p696_p5)
}
 0x109   : > { %s754_s14 = smov 128   ;;  %s755_s16 = smov 8  }
 0x10a   : > { %606 = dma.vmem_to_hbm [thread:$0]  (%p826_p4), %s466_s29, 512, %s468_s21, %s452_s7, %s754_s14, %s754_s14, %s755_s16  }
 0x10b PF: > { %p612_p6 = scmp.ge.s32.totalorder %s750_s23, 2  ;;  %s482_s17 = sand.u32 1, %s730_s18  }
 0x10c   : > { %s483_s24 = scalar_lea.sflag [#allocation3], %s482_s17 }
 0x10d   : > { %p609_p7 = pnand %p612_p6, %p833_p8 }
 0x10f   : > { %p610_p9 = pneg %p609_p7 }
 0x111   : > { %725 = dma.done.wait (%p610_p9), %s483_s24, 512  }
 0x112   : > { %727 = vsyncadd (%p610_p9), %s483_s24, 4294966784  ;;  %s18_s23 = sadd.s32 1, %s750_s23   ;;  %s971_s18 = smov %s734_s19 }
 0x113   : > { %p15_p10 = scmp.ge.s32.totalorder %s18_s23, 4   ;;  %s972_s19 = smov %s738_s20 }
 0x114   : > { %s973_s20 = smov %s839_s6  ;;  %s974_s21 = smov %s746_s22 }
 0x115   : > { %s975_s22 = smov %s977_s26  ;;  %17 = sbr.rel (!%p15_p10) target bundleno = 4 (0x4), region = 75 }
 0x11a   :  { %489 = vsyncpa [#allocation3], 1 }
 0x11b   :  { %491 = vsyncpa [#allocation3 + $0x1], 1 }

</bundles_post_ra>
